<compile_context>
chip_gen: v5e
topology: v5e:2x2
jax: 0.10.0
libtpu: 0.0.40
codegen_flags: <defaults>
</compile_context>

<pallas_src>
import functools

import jax
import jax.numpy as jnp
import numpy as np
from jax.experimental import pallas as pl
from jax.experimental.pallas import tpu as pltpu


def _temporal_conv_kernel(x_ref, w_ref, b_ref, out_ref, slab_ref, *,
                          c_in, c_out, kmax, dil, T, N, b_tile):
    """One grid step = b_tile batch elements.

    x_ref    [b_tile, c_in, TN]          activations (compute dtype)
    w_ref    [2*c_out, kmax*c_in]        stacked taps, columns grouped by tap j
    b_ref    [2*c_out, 1]                merged bias (f32)
    out_ref  [b_tile, c_out, TN]         gated output (f32)
    slab_ref VMEM [kmax*c_in, b_tile*TN] shifted-x slab (compute dtype)
    """
    TN = T * N
    cdt = x_ref.dtype

    # ---- Build the shifted-x slab: taps in the contraction dimension -------
    # slab rows [j*c_in:(j+1)*c_in], col (b*TN + t) = x[b, :, t - j*dil*N]
    # (zero for t < j*dil*N => the causal left zero-padding).  Write-only
    # stores, no read-modify-write.
    for b in range(b_tile):
        base = b * TN
        xb = x_ref[b]                                            # [c_in, TN]
        slab_ref[0:c_in, base:base + TN] = xb                    # tap 0, unshifted
        for j in range(1, kmax):
            off = j * dil * N
            r0, r1 = j * c_in, (j + 1) * c_in
            if off >= TN:      # tap lies entirely in the causal zero padding
                slab_ref[r0:r1, base:base + TN] = jnp.zeros((c_in, TN), cdt)
            else:
                slab_ref[r0:r1, base:base + off] = jnp.zeros((c_in, off), cdt)
                slab_ref[r0:r1, base + off:base + TN] = xb[:, :TN - off]

    # ---- One MXU matmul for the merged (Kt,1)+(5,1) dilated causal conv ----
    acc = jnp.dot(w_ref[...], slab_ref[...],
                  preferred_element_type=jnp.float32) + b_ref[...]  # [2c_out, b_tile*TN] f32

    p_all = acc[:c_out, :]
    g_all = jax.nn.sigmoid(acc[c_out:, :])                       # gate (f32, EUP)

    # ---- Fused Align residual + GLU gate, full-width store per element -----
    for b in range(b_tile):
        sl = slice(b * TN, (b + 1) * TN)
        p = p_all[:, sl]
        g = g_all[:, sl]
        if c_in == c_out:
            res = x_ref[b].astype(jnp.float32)
            out_ref[b] = ((p + res) * g).astype(out_ref.dtype)
        elif c_in < c_out:
            # Align zero-pads channels: residual touches only the first c_in
            # rows; don't materialize a zero tile for the rest.
            res = x_ref[b].astype(jnp.float32)
            out_ref[b, 0:c_in, :] = ((p[:c_in, :] + res) * g[:c_in, :]).astype(out_ref.dtype)
            out_ref[b, c_in:c_out, :] = (p[c_in:, :] * g[c_in:, :]).astype(out_ref.dtype)
        else:
            # c_in > c_out: the 1x1 Align conv (+ bias) was folded into the
            # tap-0 / p-half block of the stacked weight host-side, so p
            # already equals p + x_in.
            out_ref[b] = (p * g).astype(out_ref.dtype)


def prepare_temporal_conv_params(params, *, kernel_size, c_in, c_out,
                                 compute_dtype=jnp.float32):
    """Runs ONCE at parameter-init time (not per forward call).

    Merges the two causal convs (and, when c_in > c_out, the 1x1 Align conv)
    into one stacked weight [2*c_out, kmax*c_in] whose column block j holds
    the effective tap for a shift of j*dilation steps back in time, plus a
    merged bias [2*c_out, 1].
    """
    kt = kernel_size
    kmax = max(kt, 5)
    w1, b1, w5, b5 = params["w1"], params["b1"], params["w5"], params["b5"]

    # causal conv:  out[t] = sum_k W[:,:,k,0] @ x[t - (K-1-k)*d]
    # => effective tap j (shift j*d back): W_eff[j] = W1[:,:,kt-1-j,0] + W5[:,:,4-j,0]
    taps = []
    for j in range(kmax):
        tap = jnp.zeros((2 * c_out, c_in), jnp.float32)
        if j < kt:
            tap = tap + w1[:, :, kt - 1 - j, 0]
        if j < 5:
            tap = tap + w5[:, :, 4 - j, 0]
        taps.append(tap)
    w_stack = jnp.concatenate(taps, axis=1)                      # [2c_out, kmax*c_in]
    b_eff = (b1 + b5).reshape(2 * c_out, 1).astype(jnp.float32)

    if c_in > c_out:
        # TODO(synk): Align class source not provided; standard STGCN Align
        # assumed (1x1 conv if c_in > c_out, zero-pad channels if c_in < c_out,
        # identity otherwise).  p + x_in = (W_eff0_p + W_align) @ x + ... so the
        # Align conv folds exactly into the tap-0 / p-half weight block.
        w_stack = w_stack.at[:c_out, :c_in].add(params["w_align"])
        b_eff = b_eff.at[:c_out, 0].add(params["b_align"])

    return {"w_stack": w_stack.astype(compute_dtype),
            "b_eff": b_eff,
            "kmax": kmax,
            "compute_dtype": compute_dtype}


def temporal_conv_layer(x, prepared, *, c_in, c_out, dilation_t, b_tile=1):
    """Forward pass.  x: [B, c_in, T, N] f32 -> [B, c_out, T, N] f32."""
    B, C, T, N = x.shape
    assert C == c_in
    TN = T * N
    kmax = prepared["kmax"]
    compute_dtype = prepared["compute_dtype"]
    w_stack = prepared["w_stack"]
    b_eff = prepared["b_eff"]

    if B % b_tile != 0:
        b_tile = 1
    x_flat = x.reshape(B, c_in, TN).astype(compute_dtype)        # free reshape, no pad/copy

    kernel = functools.partial(_temporal_conv_kernel, c_in=c_in, c_out=c_out,
                               kmax=kmax, dil=dilation_t, T=T, N=N, b_tile=b_tile)

    # Rough per-step VMEM footprint -> explicit scoped-vmem limit with headroom
    # (v7x has only 64 MiB of VMEM per TensorCore).
    itemsize = jnp.dtype(compute_dtype).itemsize
    step_bytes = (2 * b_tile * c_in * TN * itemsize              # x block, double-buffered
                  + 2 * b_tile * c_out * TN * 4                  # out block, double-buffered
                  + 2 * (w_stack.size * itemsize + 2 * c_out * 4)
                  + kmax * c_in * b_tile * TN * itemsize         # shifted-x slab scratch
                  + 4 * c_out * b_tile * TN * 4)                 # acc / gate temporaries
    vmem_limit = int(min(max(2 * step_bytes, 16 << 20), 48 << 20))

    out_flat = pl.pallas_call(
        kernel,
        out_shape=jax.ShapeDtypeStruct((B, c_out, TN), jnp.float32),
        grid_spec=pltpu.PrefetchScalarGridSpec(
            num_scalar_prefetch=0,
            grid=(B // b_tile,),
            in_specs=[
                pl.BlockSpec((b_tile, c_in, TN), lambda b: (b, 0, 0)),
                pl.BlockSpec((2 * c_out, kmax * c_in), lambda b: (0, 0)),
                pl.BlockSpec((2 * c_out, 1), lambda b: (0, 0)),
            ],
            out_specs=pl.BlockSpec((b_tile, c_out, TN), lambda b: (b, 0, 0)),
            scratch_shapes=[pltpu.VMEM((kmax * c_in, b_tile * TN), compute_dtype)],
        ),
        compiler_params=pltpu.CompilerParams(
            dimension_semantics=("parallel",),
            vmem_limit_bytes=vmem_limit),
    )(x_flat, w_stack, b_eff)

    return out_flat.reshape(B, c_out, T, N)


# ---------------------------- pure-JAX reference ----------------------------
def _ref_causal_conv(x, w, b, kt, d):
    pad = (kt - 1) * d
    xp = jnp.pad(x, ((0, 0), (0, 0), (pad, 0), (0, 0)))
    y = jax.lax.conv_general_dilated(
        xp, w, window_strides=(1, 1), padding="VALID",
        rhs_dilation=(d, 1), dimension_numbers=("NCHW", "OIHW", "NCHW"))
    return y + b[None, :, None, None]


def temporal_conv_layer_ref(x, params, *, kernel_size, c_in, c_out, dilation_t):
    if c_in > c_out:
        x_in = (jnp.einsum("oc,bctn->botn", params["w_align"], x)
                + params["b_align"][None, :, None, None])
    elif c_in < c_out:
        B, _, T, N = x.shape
        x_in = jnp.concatenate(
            [x, jnp.zeros((B, c_out - c_in, T, N), x.dtype)], axis=1)
    else:
        x_in = x
    y = (_ref_causal_conv(x, params["w1"], params["b1"], kernel_size, dilation_t)
         + _ref_causal_conv(x, params["w5"], params["b5"], 5, dilation_t))
    p = y[:, :c_out]
    q = y[:, c_out:]
    return (p + x_in) * jax.nn.sigmoid(q)


# ------------------------------------ main -----------------------------------
if __name__ == "__main__":
    key = jax.random.PRNGKey(0)

    def uinit(k, shape, fan_in):
        bound = 1.0 / np.sqrt(fan_in)
        return jax.random.uniform(k, shape, jnp.float32, -bound, bound)

    def make_case(k, B, c_in, c_out, T, N, kt):
        ks = jax.random.split(k, 7)
        x = jax.random.normal(ks[0], (B, c_in, T, N), jnp.float32)
        params = {
            "w1": uinit(ks[1], (2 * c_out, c_in, kt, 1), c_in * kt),
            "b1": uinit(ks[2], (2 * c_out,), c_in * kt),
            "w5": uinit(ks[3], (2 * c_out, c_in, 5, 1), c_in * 5),
            "b5": uinit(ks[4], (2 * c_out,), c_in * 5),
            # Align params (used only when c_in > c_out).
            "w_align": uinit(ks[5], (c_out, c_in), c_in),
            "b_align": uinit(ks[6], (c_out,), c_in),
        }
        return x, params

    def run_case(k, *, B, c_in, c_out, T, N, kt, dil, b_tile, compute_dtype,
                 rtol, atol):
        x, params = make_case(k, B, c_in, c_out, T, N, kt)
        ref = temporal_conv_layer_ref(x, params, kernel_size=kt, c_in=c_in,
                                      c_out=c_out, dilation_t=dil)
        prepared = prepare_temporal_conv_params(
            params, kernel_size=kt, c_in=c_in, c_out=c_out,
            compute_dtype=compute_dtype)
        out = temporal_conv_layer(x, prepared, c_in=c_in, c_out=c_out,
                                  dilation_t=dil, b_tile=b_tile)
        out = jax.block_until_ready(out)
        np.testing.assert_allclose(np.asarray(out), np.asarray(ref),
                                   rtol=rtol, atol=atol)

    k0, k1, k2, k3 = jax.random.split(key, 4)

    # Main config (c_in == c_out): f32, one batch element per (parallel) grid step.
    run_case(k0, B=2, c_in=4, c_out=4, T=16, N=16, kt=3, dil=2,
             b_tile=1, compute_dtype=jnp.float32, rtol=1e-4, atol=1e-4)
    # Same config, batch-folded grid step (v5e/v6e small-shape path) + bf16 compute.
    run_case(k1, B=2, c_in=4, c_out=4, T=16, N=16, kt=3, dil=2,
             b_tile=2, compute_dtype=jnp.bfloat16, rtol=1e-1, atol=1e-1)
    # c_in > c_out: 1x1 Align conv folded into the stacked weight host-side.
    run_case(k2, B=2, c_in=8, c_out=4, T=16, N=16, kt=3, dil=2,
             b_tile=1, compute_dtype=jnp.float32, rtol=1e-4, atol=1e-4)
    # c_in < c_out: residual added only to the first c_in output channels.
    run_case(k3, B=2, c_in=2, c_out=4, T=16, N=16, kt=3, dil=2,
             b_tile=1, compute_dtype=jnp.float32, rtol=1e-4, atol=1e-4)

    print("KERNEL_OK")
</pallas_src>

<mosaic_0001>
module attributes {stable_mosaic.version = 11 : i64} {
  func.func @_temporal_conv_kernel(%arg0: i32, %arg1: memref<1x4x256xf32, #tpu.memory_space<vmem>>, %arg2: memref<8x20xf32, #tpu.memory_space<vmem>>, %arg3: memref<8x1xf32, #tpu.memory_space<vmem>>, %arg4: memref<1x4x256xf32, #tpu.memory_space<vmem>>, %arg5: memref<20x256xf32, #tpu.memory_space<vmem>>) attributes {dimension_semantics = [#tpu.dimension_semantics<parallel>], iteration_bounds = array<i64: 2>, scalar_prefetch = 0 : i64, scratch_operands = 1 : i64, tpu.core_type = #tpu.core_type<tc>, window_params = [{transform_indices = @transform_0, window_bounds = array<i64: 1, 4, 256>}, {pipeline_mode = #tpu.pipeline_mode<synchronous>, transform_indices = @transform_1, window_bounds = array<i64: 8, 20>}, {pipeline_mode = #tpu.pipeline_mode<synchronous>, transform_indices = @transform_2, window_bounds = array<i64: 8, 1>}, {transform_indices = @transform_3, window_bounds = array<i64: 1, 4, 256>}]} {
    %c0 = arith.constant 0 : index
    %c0_0 = arith.constant 0 : index
    %c0_1 = arith.constant 0 : index
    %0 = vector.load %arg1[%c0, %c0_0, %c0_1] : memref<1x4x256xf32, #tpu.memory_space<vmem>>, vector<1x4x256xf32>
    %1 = vector.shape_cast %0 : vector<1x4x256xf32> to vector<4x256xf32>
    %c0_2 = arith.constant 0 : index
    %c0_3 = arith.constant 0 : index
    %2 = vector.load %arg5[%c0_2, %c0_3] : memref<20x256xf32, #tpu.memory_space<vmem>>, vector<4x256xf32>
    tpu.vector_store %arg5[%c0_2, %c0_3], %1 {strides = array<i32>} : memref<20x256xf32, #tpu.memory_space<vmem>>, vector<4x256xf32>,
    %cst = arith.constant 0.000000e+00 : f32
    %3 = vector.broadcast %cst : f32 to vector<4x32xf32>
    %c4 = arith.constant 4 : index
    %c0_4 = arith.constant 0 : index
    %4 = vector.load %arg5[%c4, %c0_4] : memref<20x256xf32, #tpu.memory_space<vmem>>, vector<4x32xf32>
    tpu.vector_store %arg5[%c4, %c0_4], %3 {strides = array<i32>} : memref<20x256xf32, #tpu.memory_space<vmem>>, vector<4x32xf32>,
    %5 = vector.extract_strided_slice %1 {offsets = [0, 0], sizes = [4, 224], strides = [1, 1]} : vector<4x256xf32> to vector<4x224xf32>
    %c4_5 = arith.constant 4 : index
    %c32 = arith.constant 32 : index
    %6 = vector.load %arg5[%c4_5, %c32] : memref<20x256xf32, #tpu.memory_space<vmem>>, vector<4x224xf32>
    tpu.vector_store %arg5[%c4_5, %c32], %5 {strides = array<i32>} : memref<20x256xf32, #tpu.memory_space<vmem>>, vector<4x224xf32>,
    %cst_6 = arith.constant 0.000000e+00 : f32
    %7 = vector.broadcast %cst_6 : f32 to vector<4x64xf32>
    %c8 = arith.constant 8 : index
    %c0_7 = arith.constant 0 : index
    %8 = vector.load %arg5[%c8, %c0_7] : memref<20x256xf32, #tpu.memory_space<vmem>>, vector<4x64xf32>
    tpu.vector_store %arg5[%c8, %c0_7], %7 {strides = array<i32>} : memref<20x256xf32, #tpu.memory_space<vmem>>, vector<4x64xf32>,
    %9 = vector.extract_strided_slice %1 {offsets = [0, 0], sizes = [4, 192], strides = [1, 1]} : vector<4x256xf32> to vector<4x192xf32>
    %c8_8 = arith.constant 8 : index
    %c64 = arith.constant 64 : index
    %10 = vector.load %arg5[%c8_8, %c64] : memref<20x256xf32, #tpu.memory_space<vmem>>, vector<4x192xf32>
    tpu.vector_store %arg5[%c8_8, %c64], %9 {strides = array<i32>} : memref<20x256xf32, #tpu.memory_space<vmem>>, vector<4x192xf32>,
    %cst_9 = arith.constant 0.000000e+00 : f32
    %11 = vector.broadcast %cst_9 : f32 to vector<4x96xf32>
    %c12 = arith.constant 12 : index
    %c0_10 = arith.constant 0 : index
    %12 = vector.load %arg5[%c12, %c0_10] : memref<20x256xf32, #tpu.memory_space<vmem>>, vector<4x96xf32>
    tpu.vector_store %arg5[%c12, %c0_10], %11 {strides = array<i32>} : memref<20x256xf32, #tpu.memory_space<vmem>>, vector<4x96xf32>,
    %13 = vector.extract_strided_slice %1 {offsets = [0, 0], sizes = [4, 160], strides = [1, 1]} : vector<4x256xf32> to vector<4x160xf32>
    %c12_11 = arith.constant 12 : index
    %c96 = arith.constant 96 : index
    %14 = vector.load %arg5[%c12_11, %c96] : memref<20x256xf32, #tpu.memory_space<vmem>>, vector<4x160xf32>
    tpu.vector_store %arg5[%c12_11, %c96], %13 {strides = array<i32>} : memref<20x256xf32, #tpu.memory_space<vmem>>, vector<4x160xf32>,
    %cst_12 = arith.constant 0.000000e+00 : f32
    %15 = vector.broadcast %cst_12 : f32 to vector<4x128xf32>
    %c16 = arith.constant 16 : index
    %c0_13 = arith.constant 0 : index
    %16 = vector.load %arg5[%c16, %c0_13] : memref<20x256xf32, #tpu.memory_space<vmem>>, vector<4x128xf32>
    tpu.vector_store %arg5[%c16, %c0_13], %15 {strides = array<i32>} : memref<20x256xf32, #tpu.memory_space<vmem>>, vector<4x128xf32>,
    %17 = vector.extract_strided_slice %1 {offsets = [0, 0], sizes = [4, 128], strides = [1, 1]} : vector<4x256xf32> to vector<4x128xf32>
    %c16_14 = arith.constant 16 : index
    %c128 = arith.constant 128 : index
    %18 = vector.load %arg5[%c16_14, %c128] : memref<20x256xf32, #tpu.memory_space<vmem>>, vector<4x128xf32>
    tpu.vector_store %arg5[%c16_14, %c128], %17 {strides = array<i32>} : memref<20x256xf32, #tpu.memory_space<vmem>>, vector<4x128xf32>,
    %c0_15 = arith.constant 0 : index
    %c0_16 = arith.constant 0 : index
    %19 = vector.load %arg2[%c0_15, %c0_16] : memref<8x20xf32, #tpu.memory_space<vmem>>, vector<8x20xf32>
    %c0_17 = arith.constant 0 : index
    %c0_18 = arith.constant 0 : index
    %20 = vector.load %arg5[%c0_17, %c0_18] : memref<20x256xf32, #tpu.memory_space<vmem>>, vector<20x256xf32>
    %cst_19 = arith.constant dense<0.000000e+00> : vector<8x256xf32>
    %21 = tpu.matmul %19, %20, %cst_19 {dimension_numbers = #tpu.dot_dimension_numbers<[1], [0], [0], [1], [0, 0, 1, 1], [], []>} : vector<8x20xf32>, vector<20x256xf32>, vector<8x256xf32> -> vector<8x256xf32>
    %c0_20 = arith.constant 0 : index
    %c0_21 = arith.constant 0 : index
    %22 = vector.load %arg3[%c0_20, %c0_21] : memref<8x1xf32, #tpu.memory_space<vmem>>, vector<8x1xf32>
    %23 = vector.broadcast %22 : vector<8x1xf32> to vector<8x256xf32>
    %24 = arith.addf %21, %23 : vector<8x256xf32>
    %25 = vector.extract_strided_slice %24 {offsets = [0, 0], sizes = [4, 256], strides = [1, 1]} : vector<8x256xf32> to vector<4x256xf32>
    %26 = vector.extract_strided_slice %24 {offsets = [4, 0], sizes = [4, 256], strides = [1, 1]} : vector<8x256xf32> to vector<4x256xf32>
    %27 = arith.negf %26 : vector<4x256xf32>
    %28 = math.exp %27 : vector<4x256xf32>
    %cst_22 = arith.constant 1.000000e+00 : f32
    %29 = vector.broadcast %cst_22 : f32 to vector<4x256xf32>
    %30 = arith.addf %29, %28 : vector<4x256xf32>
    %31 = arith.divf %29, %30 : vector<4x256xf32>
    %c0_23 = arith.constant 0 : index
    %c0_24 = arith.constant 0 : index
    %c0_25 = arith.constant 0 : index
    %32 = vector.load %arg1[%c0_23, %c0_24, %c0_25] : memref<1x4x256xf32, #tpu.memory_space<vmem>>, vector<1x4x256xf32>
    %33 = vector.shape_cast %32 : vector<1x4x256xf32> to vector<4x256xf32>
    %34 = arith.addf %25, %33 : vector<4x256xf32>
    %35 = arith.mulf %34, %31 : vector<4x256xf32>
    %c0_26 = arith.constant 0 : index
    %c0_27 = arith.constant 0 : index
    %c0_28 = arith.constant 0 : index
    %36 = vector.load %arg4[%c0_26, %c0_27, %c0_28] : memref<1x4x256xf32, #tpu.memory_space<vmem>>, vector<1x4x256xf32>
    %37 = vector.shape_cast %36 : vector<1x4x256xf32> to vector<4x256xf32>
    %38 = vector.shape_cast %35 : vector<4x256xf32> to vector<1x4x256xf32>
    tpu.vector_store %arg4[%c0_26, %c0_27, %c0_28], %38 {strides = array<i32>} : memref<1x4x256xf32, #tpu.memory_space<vmem>>, vector<1x4x256xf32>,
    return
  }
  func.func @transform_0(%arg0: i32) -> (i32, i32, i32) {
    %c0_i32 = arith.constant 0 : i32
    %c0_i32_0 = arith.constant 0 : i32
    %c0_i32_1 = arith.constant 0 : i32
    return %arg0, %c0_i32, %c0_i32_0 : i32, i32, i32
  }
  func.func @transform_1(%arg0: i32) -> (i32, i32) {
    %c0_i32 = arith.constant 0 : i32
    %c0_i32_0 = arith.constant 0 : i32
    %c0_i32_1 = arith.constant 0 : i32
    return %c0_i32, %c0_i32_0 : i32, i32
  }
  func.func @transform_2(%arg0: i32) -> (i32, i32) {
    %c0_i32 = arith.constant 0 : i32
    %c0_i32_0 = arith.constant 0 : i32
    %c0_i32_1 = arith.constant 0 : i32
    return %c0_i32, %c0_i32_0 : i32, i32
  }
  func.func @transform_3(%arg0: i32) -> (i32, i32, i32) {
    %c0_i32 = arith.constant 0 : i32
    %c0_i32_0 = arith.constant 0 : i32
    %c0_i32_1 = arith.constant 0 : i32
    return %arg0, %c0_i32, %c0_i32_0 : i32, i32, i32
  }
}

</mosaic_0001>

<bundles_post_ra>
// kernel: tpu_custom_call.1
= control target key start
LH: loop header
LB: loop body
LE: loop exit
PB: predicated region body
PF: predicated region fallthrough
CT: control target
= control target key end

     0   :  { %8 = vsyncpa [#allocation4], 0  ;;  %s807_s0 = inlined_call_operand.hbm [shape: f32[2,4,256], index: 0, kind: input, shape index: {}]   ;;  %s808_s1 = inlined_call_operand.vmem [shape: f32[8,20], index: 1, kind: input, shape index: {}]   ;;  %s809_s2 = inlined_call_operand.vmem [shape: f32[8,1], index: 2, kind: input, shape index: {}]   ;;  %s810_s3 = inlined_call_operand.hbm [shape: f32[2,4,256], index: 3, kind: output, shape index: {}]  }
   0x1   :  { %10 = vsyncpa [#allocation4 + $0x1], 0 }
   0x2   :  { %11 = vsyncpa [#allocation5], 0 }
   0x3   :  { %13 = vsyncpa [#allocation5 + $0x1], 0  ;;  %s667_s12 = smov 0   ;;  %s669_s13 = smov 0  }
   0x4   :  { %s671_s14 = smov 0   ;;  %s673_s15 = smov 0  }
   0x5 LB: > { %s688_s16 = sadd.s32 4294967295, %s640_s15   ;;  %s462_s17 = sadd.s32 4294967294, %s640_s15   ;;  %s640_s15 = sphi %s673_s15, %s820_s15   ;;  %s636_s14 = sphi %s671_s14, %s819_s14   ;;  %s632_s13 = sphi %s669_s13, %s818_s13   ;;  %s628_s12 = sphi %s667_s12, %s817_s12  }
   0x6   : > { %s692_s18 = sadd.s32 1, %s640_s15   ;;  %s26_s19 = sadd.s32 1, %s636_s14 }
   0x7   : > { %s23_s20 = ssub.s32 %s640_s15, %s692_s18  ;;  %p33_p0 = scmp.ne.s32.totalorder %s636_s14, %s632_s13 }
   0x8   : > { %p24_p1 = scmp.eq.s32.totalorder %s23_s20, 0  ;;  %p34_p2 = scmp.eq.s32.totalorder %s640_s15, 0 }
   0x9   : > { %p39_p3 = scmp.ne.s32.totalorder %s632_s13, %s628_s12  ;;  %p40_p4 = scmp.eq.s32.totalorder %s688_s16, 0 }
   0xa   : > { %s704_s21 = scalar_select %p24_p1, %s636_s14, %s26_s19  }
   0xb   : > { %p706_p5 = por %p34_p2, %p33_p0  ;;  %p710_p6 = por %p40_p4, %p39_p3 }
   0xc   : > { %p105_p7 = scmp.eq.s32.totalorder %s688_s16, 1  ;;  %p111_p8 = scmp.eq.s32.totalorder %s462_s17, 1 }
   0xd   : > { %p496_p10 = scmp.lt.s32.totalorder %s640_s15, 2  ;;  %s137_s26 = sand.u32 1, %s636_s14  }
   0xe   : > { %p717_p11 = por %p105_p7, %p33_p0  ;;  %p721_p12 = por %p111_p8, %p39_p3 }
   0xf   : > { %s482_s27 = sshll.u32 %s640_s15, 3  ;;  %s465_s28 = sshll.u32 %s137_s26, 3 }
  0x10   : > { %s146_s4 = scalar_lea.hbm %s807_s0, %s482_s27  ;;  %s141_s6 = scalar_lea.vmem [#allocation3], %s465_s28 }
  0x11   : > { %s148_s5 = sshll.u32 %s146_s4, 4  ;;  %s150_s7 = sshll.u32 %s141_s6, 4  ;;  %s149_s5 = int_to_ptr.hbm [resolvable:$true] %s148_s5  ;;  %s151_s7 = int_to_ptr.vmem [resolvable:$true] %s150_s7 }
  0x12   : > { %p732_p13 = pnand %p496_p10, %p706_p5  ;;  %p468_p0 = scmp.ge.s32.totalorder %s640_s15, 1 }
  0x13   : > { %p155_p1 = scmp.lt.s32.totalorder %s640_s15, 3  ;;  %s138_s9 = scalar_lea.sflag [#allocation4], %s137_s26 }
  0x14   : > { %s544_s10 = sshra.s32 %s149_s5, 4  ;;  %p548_p3 = pneg %p732_p13  ;;  %s545_s10 = int_to_ptr.hbm [resolvable:$true] %s544_s10 }
  0x15   : > { %s546_s11 = scalar_lea.hbm %s545_s10, 8  ;;  %s551_s20 = scalar_lea.hbm %s807_s0, 16 }
  0x16   : > { %p547_p2 = scmp.ne.s32.totalorder %s545_s10, %s546_s11  ;;  %p552_p5 = scmp.lt.s32.totalorder %s545_s10, %s807_s0 }
  0x17   : > { %p553_p8 = scmp.lt.s32.totalorder %s551_s20, %s546_s11 }
  0x18   : > { %p549_p4 = pnand %p548_p3, %p547_p2 }
  0x19   : > { %p554_p10 = por %p553_p8, %p552_p5 }
  0x1a   : > { %p550_p7 = pneg %p549_p4 }
  0x1c   : > { %p555_p9 = pnand %p554_p10, %p550_p7 }
  0x1e   : > { %558 = shalt.err (!%p555_p9)
}
  0x1f   : > { %491 = dma.hbm_to_vmem [thread:$0]  (!%p732_p13), %s149_s5, 128, %s151_s7, %s138_s9  }
  0x20   : > { %p156_p2 = pnand %p468_p0, %p155_p1 }
  0x21   : > { %s753_s26 = sand.u32 (!%p156_p2), 1, %s632_s13  }
  0x22   : > { %159 = sbr.rel (%p156_p2) target bundleno = 375 (0x177), region = 32  ;;  %s469_s28 = sshll.u32 (!%p156_p2), %s753_s26, 3 }
  0x23   : > { %s162_s29 = scalar_lea.sflag (!%p156_p2), [#allocation4], %s753_s26  ;;  %s165_s30 = scalar_lea.vmem (!%p156_p2), [#allocation3], %s469_s28 }
  0x27   : > { %619 = dma.done.wait (%p710_p6), %s162_s29, 128  }
  0x28   : > { %621 = vsyncadd (%p710_p6), %s162_s29, 4294967168  ;;  %v189_v0 = vld [vmem:[%s165_s30] sm:$0xff]  ;;  %vm215_vm0 = vcmask 519168   ;;  %v642_v3 = vmov 0.0   ;;  %s643_s4 = smov 32   ;;  %s644_s23 = smov 64  }
  0x29   : > { %191 = vst [vmem:[#allocation1] ss:$2 sm:$0xff] %v189_v0  ;;  %s645_s5 = smov 96   ;;  %vm198_vm1 = vcmask 261124   ;;  %vm212_vm2 = vcmask 1047812   ;;  %vm231_vm3 = vcmask 785412  }
  0x2a   : > { %249 = vst [vmem:[#allocation2 + $0x28] sm:$0xf] %v189_v0  ;;  %vm208_vm4 = vcmask 261120   ;;  %vm267_vm5 = vcmask 1043456   ;;  %v257_v15 = vld [vmem:[%s809_s2] sm:$0xff]  ;;  %vm228_vm6 = vcmask 1043968  }
  0x2b   : > { %216 = vst.msk [vmem:[#allocation2 + $0x10] sm:$0xf] %vm215_vm0, %v642_v3  ;;  %v646_v16 = vmov 0   ;;  %vm224_vm7 = vcmask 523264   ;;  %vm245_vm8 = vcmask 1048324   ;;  %vm241_vm9 = vcmask 785408  }
  0x2c   : > { %248 = vst [vmem:[#allocation2 + $0x20] sm:$0xf] %v642_v3  ;;  %535 = vset.pattern.permute.xlu0 %v646_v16  ;;  %v250_v25 = vld [vmem:[%s808_s1] sm:$0xff]  ;;  %vm263_vm10 = vcmask 162816   ;;  %s483_s10 = sshll.u32 %s688_s16, 3  ;;  %s188_s16 = scalar_lea.vmem [#allocation6], %s469_s28 }
  0x2d   : > { %199 = vst.msk [vmem:[#allocation2] sm:$0xf0] %vm198_vm1, %v642_v3  ;;  %s387_s19 = scalar_lea.hbm %s810_s3, %s483_s10  ;;  %s389_s20 = sshll.u32 %s188_s16, 4  ;;  %s390_s20 = int_to_ptr.vmem [resolvable:$true] %s389_s20 }
  0x2e   : > { %232 = vst.msk [vmem:[#allocation2 + $0x10] sm:$0xf0] %vm231_vm3, %v642_v3  ;;  %s391_s22 = sshll.u32 %s387_s19, 4  ;;  %s376_s27 = scalar_lea.sflag [#allocation5], %s753_s26  ;;  %s392_s22 = int_to_ptr.hbm [resolvable:$true] %s391_s22 }
  0x2f   : > { %s588_s29 = sshra.s32 %s392_s22, 4  ;;  %s594_s28 = scalar_lea.hbm %s810_s3, 16  ;;  %s589_s29 = int_to_ptr.hbm [resolvable:$true] %s588_s29 }
  0x30   : > { %v192_v1 = vld.sshfl [vmem:[#allocation1] sm:$0xff pattern:$0x75316420]  ;;  %v193_v2 = vld.sshfl [vmem:[#allocation1 + $0x8] sm:$0xff pattern:$0x75316420]  ;;  %p595_p0 = scmp.lt.s32.totalorder %s589_s29, %s810_s3 }
  0x31   : > { %201 = vst [vmem:[#allocation1 + $0x1] ss:$2 sm:$0xff] %v189_v0  ;;  %v256_v14 = vld [vmem:[#allocation2 + $0x28] sm:$0xf]  ;;  %s590_s30 = scalar_lea.hbm %s589_s29, 8 }
  0x32   : > { %196 = vst [vmem:[#allocation2] sm:$0xf] %v192_v1  ;;  %473 = vmatpush.msk.msra.mxu1 %vm267_vm5, %v256_v14  ;;  %p591_p6 = scmp.ne.s32.totalorder %s589_s29, %s590_s30  ;;  %p596_p1 = scmp.lt.s32.totalorder %s594_s28, %s590_s30 }
  0x33   : > { %197 = vst [vmem:[#allocation2 + $0x8] sm:$0xf] %v193_v2  ;;  %v255_v12 = vld [vmem:[#allocation2 + $0x20] sm:$0xf] }
  0x34   : > { %471 = vmatpush.msk.msra.mxu0 %vm267_vm5, %v255_v12  ;;  %p592_p9 = pnand %p591_p6, %p717_p11  ;;  %p597_p3 = por %p596_p1, %p595_p0 }
  0x36   : > { %p593_p13 = pneg %p592_p9 }
  0x38   : > { %v202_v4 = vld.sshfl [vmem:[#allocation1] sm:$0xff pattern:$0x75316420]  ;;  %v203_v5 = vld.sshfl [vmem:[#allocation1 + $0x8] sm:$0xff pattern:$0x75316420]  ;;  %p598_p4 = pnand %p597_p3, %p593_p13 }
  0x39   : > { %217 = vst [vmem:[#allocation1] ss:$2 sm:$0xff] %v189_v0  ;;  %204 = vrot.lane.b32.xlu2 %v202_v4, %s643_s4 }
  0x40   : > { %v218_v6 = vld.sshfl [vmem:[#allocation1] sm:$0xff pattern:$0x75316420]  ;;  %v219_v7 = vld.sshfl [vmem:[#allocation1 + $0x8] sm:$0xff pattern:$0x75316420] }
  0x41   : > { %220 = vrot.lane.b32.xlu0 %v218_v6, %s644_s23  ;;  %234 = vst [vmem:[#allocation1 + $0x1] ss:$2 sm:$0xff] %v189_v0  ;;  %206 = vrot.lane.b32.xlu2 %v203_v5, %s643_s4 }
  0x48   : > { %v235_v8 = vld.sshfl [vmem:[#allocation1] sm:$0xff pattern:$0x75316420]  ;;  %v236_v9 = vld.sshfl [vmem:[#allocation1 + $0x8] sm:$0xff pattern:$0x75316420] }
  0x49   : > { %222 = vrot.lane.b32.xlu0 %v219_v7, %s644_s23  ;;  %237 = vrot.lane.b32.xlu1 %v235_v8, %s645_s5  ;;  %354 = vst [vmem:[#allocation1] ss:$2 sm:$0xff] %v189_v0 }
  0x50   : > { %v356_v57 = vld.sshfl [vmem:[#allocation1 + $0x8] sm:$0xff pattern:$0x75316420]  ;;  %v355_v59 = vld.sshfl [vmem:[#allocation1] sm:$0xff pattern:$0x75316420] }
  0x51   : > { %239 = vrot.lane.b32.xlu1 %v236_v9, %s645_s5  ;;  %260 = vperm.xlu0 %535, %v257_v15  }
  0x93   : > { %v205_v10 = vpop.permute.xlu2 %204 }
  0x94   : > { %213 = vst.msk [vmem:[#allocation2] sm:$0xf0] %vm212_vm2, %v205_v10 }
  0x9b   : > { %v207_v11 = vpop.permute.xlu2 %206  ;;  %v251_v23 = vld [vmem:[#allocation2] sm:$0xff] }
  0x9c   : > { %v209_v13 = vsel %vm208_vm4, %v205_v10, %v207_v11 }
  0x9d   : > { %214 = vst [vmem:[#allocation2 + $0x8] sm:$0xf0] %v209_v13 }
  0xa4   : > { %v252_v27 = vld [vmem:[#allocation2 + $0x8] sm:$0xff] }
  0xb3   : > { %v221_v17 = vpop.permute.xlu0 %220 }
  0xb4   : > { %229 = vst.msk [vmem:[#allocation2 + $0x10] sm:$0xf] %vm228_vm6, %v221_v17 }
  0xbb   : > { %v223_v18 = vpop.permute.xlu0 %222  ;;  %v238_v19 = vpop.permute.xlu1 %237 }
  0xbc   : > { %v225_v20 = vsel %vm224_vm7, %v221_v17, %v223_v18  ;;  %246 = vst.msk [vmem:[#allocation2 + $0x10] sm:$0xf0] %vm245_vm8, %v238_v19 }
  0xbd   : > { %230 = vst [vmem:[#allocation2 + $0x18] sm:$0xf] %v225_v20 }
  0xc3   : > { %v240_v21 = vpop.permute.xlu1 %239  ;;  %v253_v22 = vld [vmem:[#allocation2 + $0x10] sm:$0xff]  ;;  %v261_v28 = vpop.permute.xlu0 %260 }
  0xc4   : > { %v242_v24 = vsel %vm241_vm9, %v238_v19, %v240_v21  ;;  %288 = vmatpush.msra.mxu0 %v253_v22 }
  0xc5   : > { %247 = vst [vmem:[#allocation2 + $0x18] sm:$0xf0] %v242_v24 }
  0xc6   : > { %289 = vmatpush.msra.mxu0 %v251_v23 }
  0xc7   : > { %472 = vmatmul.msk.f32.vlgmr.msra.gmra.mxu0 %vm263_vm10, %v250_v25 }
  0xcc   : > { %v254_v26 = vld [vmem:[#allocation2 + $0x18] sm:$0xff] }
  0xcd   : > { %308 = vmatpush.msra.mxu1 %v254_v26 }
  0xcf   : > { %309 = vmatpush.msra.mxu1 %v252_v27 }
  0xd0   : > { %474 = vmatmul.msk.f32.vlgmr.msra.gmra.mxu1 %vm263_vm10, %v250_v25 }
 0x144   : > { %v291_v29 = vpop.f32.mrf.mxu0 }
 0x145   : > { %v292_v30 = vadd.f32 %v291_v29, %v261_v28 }
 0x147   : > { %v475_v31 = vmul.f32 -1.442695, %v292_v30  ;;  %v359_v0 = vadd.f32 %v355_v59, %v292_v30 }
 0x149   : > { %536 = vpow2.f32 %v475_v31 }
 0x14d   : > { %v311_v32 = vpop.f32.mrf.mxu1 }
 0x14e   : > { %v312_v33 = vadd.f32 %v311_v32, %v261_v28 }
 0x14f   : > { %v537_v34 = vpop.eup %536 }
 0x150   : > { %v320_v35 = vadd.f32 1.0, %v537_v34  ;;  %v476_v36 = vmul.f32 -1.442695, %v312_v33  ;;  %v360_v62 = vadd.f32 %v356_v57, %v312_v33 }
 0x152   : > { %538 = vrcp.f32 %v320_v35  ;;  %vm327_vm11 = vweird.f32 %v320_v35  ;;  %v333_v46 = vand.u32 2147483648, %v320_v35  ;;  %v331_v47 = vand.u32 2147483647, %v320_v35 }
 0x153   : > { %540 = vpow2.f32 %v476_v36 }
 0x154   : > { %v334_v53 = vor.u32 1.1754944e-38, %v333_v46  ;;  %vm332_vm15 = vcmp.eq.f32.partialorder %v331_v47, 8.507059e+37 }
 0x158   : > { %v539_v37 = vpop.eup %538 }
 0x159   : > { %v541_v38 = vpop.eup %540  ;;  %v323_v39 = vmul.f32 %v539_v37, %v320_v35  ;;  %vm328_vm12 = vweird.f32 %v539_v37 }
 0x15a   : > { %v321_v40 = vadd.f32 1.0, %v541_v38  ;;  %vm329_vm13 = vmor %vm327_vm11, %vm328_vm12 }
 0x15b   : > { %v324_v41 = vsub.f32 1.0, %v323_v39 }
 0x15c   : > { %542 = vrcp.f32 %v321_v40  ;;  %v348_v49 = vand.u32 2147483648, %v321_v40  ;;  %v346_v52 = vand.u32 2147483647, %v321_v40  ;;  %vm342_vm0 = vweird.f32 %v321_v40 }
 0x15d   : > { %v325_v42 = vmul.f32 %v539_v37, %v324_v41 }
 0x15e   : > { %v349_v56 = vor.u32 1.1754944e-38, %v348_v49  ;;  %vm347_vm2 = vcmp.eq.f32.partialorder %v346_v52, 8.507059e+37 }
 0x15f   : > { %v326_v44 = vadd.f32 %v539_v37, %v325_v42 }
 0x161   : > { %v330_v50 = vsel %vm329_vm13, %v539_v37, %v326_v44 }
 0x162   : > { %v543_v43 = vpop.eup %542  ;;  %v335_v55 = vsel %vm332_vm15, %v334_v53, %v330_v50 }
 0x163   : > { %v338_v45 = vmul.f32 %v543_v43, %v321_v40  ;;  %vm343_vm14 = vweird.f32 %v543_v43  ;;  %v363_v61 = vrot.slane %v335_v55, 4 }
 0x164   : > { %vm344_vm1 = vmor %vm342_vm0, %vm343_vm14 }
 0x165   : > { %v339_v48 = vsub.f32 1.0, %v338_v45  ;;  %v367_v2 = vmul.f32 %v363_v61, %v359_v0 }
 0x167   : > { %v340_v51 = vmul.f32 %v543_v43, %v339_v48 }
 0x169   : > { %v341_v54 = vadd.f32 %v543_v43, %v340_v51 }
 0x16b   : > { %v345_v58 = vsel %vm344_vm1, %v543_v43, %v341_v54 }
 0x16c   : > { %v350_v60 = vsel %vm347_vm2, %v349_v56, %v345_v58 }
 0x16d   : > { %v364_v63 = vrot.slane %v350_v60, 4 }
 0x16f   : > { %v368_v1 = vmul.f32 %v364_v63, %v360_v62 }
 0x171   : > { %v371_v3 = vrot.slane %v368_v1, 4 }
 0x173   : > { %v372_v4 = vsel %vm267_vm5, %v367_v2, %v371_v3 }
 0x174   : > { %374 = vst [vmem:[%s188_s16] sm:$0xff] %v372_v4 }
 0x175   : > { %601 = shalt.err (!%p598_p4)
}
 0x176   : > { %486 = dma.vmem_to_hbm [thread:$0]  (%p717_p11), %s390_s20, 128, %s392_s22, %s376_s27  }
 0x177 PF: > { %s403_s26 = sand.u32 1, %s628_s12   ;;  %p816_p7 = scmp.ge.s32.totalorder %s640_s15, 2 }
 0x178   : > { %s404_s7 = scalar_lea.sflag [#allocation5], %s403_s26 }
 0x179   : > { %p493_p5 = pnand %p816_p7, %p721_p12 }
 0x17b   : > { %p494_p8 = pneg %p493_p5 }
 0x17d   : > { %623 = dma.done.wait (%p494_p8), %s404_s7, 128  }
 0x17e   : > { %625 = vsyncadd (%p494_p8), %s404_s7, 4294967168  ;;  %p16_p10 = scmp.ge.s32.totalorder %s692_s18, 4   ;;  %s817_s12 = smov %s632_s13 }
 0x17f   : > { %s818_s13 = smov %s636_s14  ;;  %s819_s14 = smov %s704_s21 }
 0x180   : > { %s820_s15 = smov %s692_s18  ;;  %18 = sbr.rel (!%p16_p10) target bundleno = 5 (0x5), region = 79 }
 0x185   :  { %410 = vsyncpa [#allocation4], 1 }
 0x186   :  { %412 = vsyncpa [#allocation4 + $0x1], 1 }
 0x187   :  { %413 = vsyncpa [#allocation5], 1 }
 0x188   :  { %415 = vsyncpa [#allocation5 + $0x1], 1 }

</bundles_post_ra>
